<compile_context>
chip_gen: v6e
topology: v6e:2x2x1
jax: 0.10.0
libtpu: 0.0.40
codegen_flags: <defaults>
</compile_context>

<pallas_src>
import jax
import jax.numpy as jnp
from jax.experimental import pallas as pl
from jax.experimental.pallas import tpu as pltpu

# ----------------------------------------------------------------------------
# Problem sizes (Ant-v4: obs dim 27, action dim 8) and padded kernel shapes
# ----------------------------------------------------------------------------
INPUT_DIMS = 27
OUTPUT_DIMS = 8

IN_PAD = 32                     # 27 -> 32 (aligned contraction dim for layer 1)
H1 = 256
H2 = 64
H2_PAD = 128                    # 64 -> 128 (lane width)
H3 = 32                         # folded into the head at pack time
HEAD = 2 * OUTPUT_DIMS          # fused mean|std head = 16 real columns
HEAD_PAD = 128                  # lane-dense output slab
BIAS_TOTAL = H1 + H2_PAD + HEAD_PAD   # 512 (all slice boundaries 128-aligned)


def _round_up(x, m):
    return ((x + m - 1) // m) * m


# ----------------------------------------------------------------------------
# Pallas kernel: 3 bf16 matmuls (f32 accumulate) + stable softplus on std lanes
# ----------------------------------------------------------------------------
def actor_critic_kernel(x_ref, w1_ref, w2_ref, wh_ref, b_ref, out_ref):
    # Packed f32 biases (static, 128-aligned slices).
    b1 = b_ref[:, 0:H1]
    b2 = b_ref[:, H1:H1 + H2_PAD]
    bh = b_ref[:, H1 + H2_PAD:BIAS_TOTAL]

    # Layer 1: (TB,32)bf16 @ (32,256)bf16 -> f32.
    h = jnp.dot(x_ref[...], w1_ref[...], preferred_element_type=jnp.float32) + b1
    h = jnp.maximum(h, 0.0)

    # Layer 2: (TB,256)bf16 @ (256,128)bf16 -> f32 (cols 64..127 are zero pad).
    h = jnp.dot(h.astype(jnp.bfloat16), w2_ref[...],
                preferred_element_type=jnp.float32) + b2
    h = jnp.maximum(h, 0.0)

    # Fused layer-3 + heads: cols [0,8) = means, [8,16) = stddev pre-activation.
    s = jnp.dot(h.astype(jnp.bfloat16), wh_ref[...],
                preferred_element_type=jnp.float32) + bh

    # Numerically stable softplus == log(1 + exp(s)); cannot overflow in f32.
    softplus = jnp.maximum(s, 0.0) + jnp.log(1.0 + jnp.exp(-jnp.abs(s))) + 1e-6

    col = jax.lax.broadcasted_iota(jnp.int32, s.shape, dimension=1)
    is_std = (col >= OUTPUT_DIMS) & (col < 2 * OUTPUT_DIMS)
    out_ref[...] = jnp.where(is_std, softplus, s)


# ----------------------------------------------------------------------------
# Wrapper: minimal batch pad, parallel batch grid (ragged last block OK)
# ----------------------------------------------------------------------------
def actor_critic_forward(state, packed_params, *, tb=1024):
    """state: (B, INPUT_DIMS) float. packed_params from pack_params().
    Returns (means, stdDevs), each (B, OUTPUT_DIMS) f32."""
    w1p, w2p, whp, bcat = packed_params
    B = state.shape[0]

    # Pad rows only to a multiple of 8 (sublane); do NOT round up to the tile.
    b_pad = _round_up(max(B, 8), 8)
    tb = max(8, (tb // 8) * 8)
    if b_pad >= 16:
        # Cap the tile at ~half the padded batch so the parallel grid has >= 2
        # steps whenever possible (keeps both v7x TensorCores occupied).
        TB = min(tb, max(8, ((b_pad // 2) // 8) * 8))
    else:
        TB = b_pad
    grid = (pl.cdiv(b_pad, TB),)

    # Pad features 27->32 and rows to b_pad, casting to bf16 in the same tiny op.
    # (Rows >= B are zeros; rows in a ragged last grid block beyond b_pad are
    #  garbage but row-independent and masked on writeback / sliced off below.)
    x = jnp.zeros((b_pad, IN_PAD), jnp.bfloat16)
    x = x.at[:B, :INPUT_DIMS].set(state.astype(jnp.bfloat16))

    flops = 2 * b_pad * (IN_PAD * H1 + H1 * H2_PAD + H2_PAD * HEAD_PAD)
    transcendentals = 2 * b_pad * HEAD_PAD  # exp + log per output lane
    bytes_accessed = (
        2 * (b_pad * IN_PAD + IN_PAD * H1 + H1 * H2_PAD + H2_PAD * HEAD_PAD)  # bf16
        + 4 * (BIAS_TOTAL + b_pad * HEAD_PAD)                                 # f32
    )

    packed_out = pl.pallas_call(
        actor_critic_kernel,
        out_shape=jax.ShapeDtypeStruct((b_pad, HEAD_PAD), jnp.float32),
        grid=grid,
        in_specs=[
            pl.BlockSpec((TB, IN_PAD), lambda i: (i, 0)),          # activations stream
            pl.BlockSpec((IN_PAD, H1), lambda i: (0, 0)),          # resident weights
            pl.BlockSpec((H1, H2_PAD), lambda i: (0, 0)),
            pl.BlockSpec((H2_PAD, HEAD_PAD), lambda i: (0, 0)),
            pl.BlockSpec((1, BIAS_TOTAL), lambda i: (0, 0)),       # packed biases
        ],
        out_specs=pl.BlockSpec((TB, HEAD_PAD), lambda i: (i, 0)),  # lane-dense slab
        compiler_params=pltpu.CompilerParams(
            dimension_semantics=("parallel",)),
        cost_estimate=pl.CostEstimate(
            flops=flops,
            transcendentals=transcendentals,
            bytes_accessed=bytes_accessed),
    )(x, w1p, w2p, whp, bcat)

    means = packed_out[:B, :OUTPUT_DIMS]
    stds = packed_out[:B, OUTPUT_DIMS:2 * OUTPUT_DIMS]
    return means, stds


# ----------------------------------------------------------------------------
# Parameter init (mimics torch.nn.Linear default U(-k,k), k=1/sqrt(fan_in)),
# stored as (in, out) for `x @ W`.
# ----------------------------------------------------------------------------
def init_linear(key, fan_in, fan_out):
    kw, kb = jax.random.split(key)
    k = 1.0 / jnp.sqrt(jnp.float32(fan_in))
    w = jax.random.uniform(kw, (fan_in, fan_out), jnp.float32, -k, k)
    b = jax.random.uniform(kb, (1, fan_out), jnp.float32, -k, k)
    return w, b


def init_params(key):
    keys = jax.random.split(key, 5)
    dims = [INPUT_DIMS, H1, H2, H3]
    params = []
    for i in range(3):
        params.append(init_linear(keys[i], dims[i], dims[i + 1]))
    params.append(init_linear(keys[3], H3, OUTPUT_DIMS))  # mean head
    params.append(init_linear(keys[4], H3, OUTPUT_DIMS))  # stddev head
    return tuple(params)


def pack_params(params):
    """Zero-pad, fuse layer-3 into the heads, cast matmul weights to bf16."""
    (w1, b1), (w2, b2), (w3, b3), (wm, bm), (ws, bs) = params

    # Algebraic fusion of the third Linear with the packed mean|std head:
    #   (h @ w3 + b3) @ Wh + bh == h @ (w3 @ Wh) + (b3 @ Wh + bh)
    w_head = jnp.concatenate([wm, ws], axis=1)          # (32, 16)
    b_head = jnp.concatenate([bm, bs], axis=1)          # (1, 16)
    w3h = w3 @ w_head                                   # (64, 16)
    b3h = b3 @ w_head + b_head                          # (1, 16)

    w1p = (jnp.zeros((IN_PAD, H1), jnp.float32)
           .at[:INPUT_DIMS, :].set(w1)).astype(jnp.bfloat16)
    w2p = (jnp.zeros((H1, H2_PAD), jnp.float32)
           .at[:, :H2].set(w2)).astype(jnp.bfloat16)
    whp = (jnp.zeros((H2_PAD, HEAD_PAD), jnp.float32)
           .at[:H2, :HEAD].set(w3h)).astype(jnp.bfloat16)

    bcat = jnp.zeros((1, BIAS_TOTAL), jnp.float32)
    bcat = bcat.at[:, 0:H1].set(b1)
    bcat = bcat.at[:, H1:H1 + H2].set(b2)
    bcat = bcat.at[:, H1 + H2_PAD:H1 + H2_PAD + HEAD].set(b3h)

    return w1p, w2p, whp, bcat


# ----------------------------------------------------------------------------
# References
# ----------------------------------------------------------------------------
def reference_forward(state, params):
    """Module-faithful f32 reference (same math as the torch forward)."""
    (w1, b1), (w2, b2), (w3, b3), (wm, bm), (ws, bs) = params
    h = jnp.maximum(state @ w1 + b1, 0.0)
    h = jnp.maximum(h @ w2 + b2, 0.0)
    h = h @ w3 + b3
    means = h @ wm + bm
    s = h @ ws + bs
    stds = jnp.maximum(s, 0.0) + jnp.log(1.0 + jnp.exp(-jnp.abs(s))) + 1e-6
    return means, stds


def reference_forward_packed(state, packed_params):
    """Precision-matched reference: same bf16 operands / fused head as the kernel."""
    w1p, w2p, whp, bcat = packed_params
    b1 = bcat[:, 0:H1]
    b2 = bcat[:, H1:H1 + H2_PAD]
    bh = bcat[:, H1 + H2_PAD:BIAS_TOTAL]
    B = state.shape[0]
    x = jnp.zeros((B, IN_PAD), jnp.bfloat16).at[:, :INPUT_DIMS].set(
        state.astype(jnp.bfloat16))
    h = jnp.maximum(jnp.dot(x, w1p, preferred_element_type=jnp.float32) + b1, 0.0)
    h = jnp.maximum(jnp.dot(h.astype(jnp.bfloat16), w2p,
                            preferred_element_type=jnp.float32) + b2, 0.0)
    s = jnp.dot(h.astype(jnp.bfloat16), whp,
                preferred_element_type=jnp.float32) + bh
    sp = jnp.maximum(s, 0.0) + jnp.log(1.0 + jnp.exp(-jnp.abs(s))) + 1e-6
    return s[:, :OUTPUT_DIMS], sp[:, OUTPUT_DIMS:2 * OUTPUT_DIMS]


if __name__ == "__main__":
    key = jax.random.PRNGKey(0)
    k_state, k_params = jax.random.split(key)

    B = 4
    state = jax.random.normal(k_state, (B, INPUT_DIMS), jnp.float32)
    params = init_params(k_params)
    packed_params = pack_params(params)

    fwd = jax.jit(actor_critic_forward)
    means, stds = fwd(state, packed_params)
    jax.block_until_ready((means, stds))

    assert means.shape == (B, OUTPUT_DIMS) and stds.shape == (B, OUTPUT_DIMS)

    # Tight check vs a reference using the same bf16 operands / fused head.
    pm, ps = reference_forward_packed(state, packed_params)
    assert jnp.allclose(means, pm, atol=1e-4, rtol=1e-4)
    assert jnp.allclose(stds, ps, atol=1e-4, rtol=1e-4)

    # Loose check vs the module-faithful f32 reference (bf16 operand rounding).
    ref_means, ref_stds = reference_forward(state, params)
    assert jnp.allclose(means, ref_means, atol=3e-2, rtol=3e-2)
    assert jnp.allclose(stds, ref_stds, atol=3e-2, rtol=3e-2)
    assert bool(jnp.all(stds > 0.0))

    print("KERNEL_OK")
</pallas_src>

<mosaic_0001>
module attributes {stable_mosaic.version = 11 : i64} {
  func.func @actor_critic_kernel(%arg0: i32, %arg1: memref<8x32xbf16, #tpu.memory_space<vmem>>, %arg2: memref<32x256xbf16, #tpu.memory_space<vmem>>, %arg3: memref<256x128xbf16, #tpu.memory_space<vmem>>, %arg4: memref<128x128xbf16, #tpu.memory_space<vmem>>, %arg5: memref<1x512xf32, #tpu.memory_space<vmem>>, %arg6: memref<8x128xf32, #tpu.memory_space<vmem>>) attributes {dimension_semantics = [#tpu.dimension_semantics<parallel>], iteration_bounds = array<i64: 1>, scalar_prefetch = 0 : i64, scratch_operands = 0 : i64, tpu.core_type = #tpu.core_type<tc>, window_params = [{transform_indices = @transform_0, window_bounds = array<i64: 8, 32>}, {pipeline_mode = #tpu.pipeline_mode<synchronous>, transform_indices = @transform_1, window_bounds = array<i64: 32, 256>}, {pipeline_mode = #tpu.pipeline_mode<synchronous>, transform_indices = @transform_2, window_bounds = array<i64: 256, 128>}, {pipeline_mode = #tpu.pipeline_mode<synchronous>, transform_indices = @transform_3, window_bounds = array<i64: 128, 128>}, {pipeline_mode = #tpu.pipeline_mode<synchronous>, transform_indices = @transform_4, window_bounds = array<i64: 1, 512>}, {transform_indices = @transform_5, window_bounds = array<i64: 8, 128>}]} {
    %c0 = arith.constant 0 : index
    %c0_0 = arith.constant 0 : index
    %0 = vector.load %arg5[%c0, %c0_0] : memref<1x512xf32, #tpu.memory_space<vmem>>, vector<1x256xf32>
    %c0_1 = arith.constant 0 : index
    %c256 = arith.constant 256 : index
    %1 = vector.load %arg5[%c0_1, %c256] : memref<1x512xf32, #tpu.memory_space<vmem>>, vector<1x128xf32>
    %c0_2 = arith.constant 0 : index
    %c384 = arith.constant 384 : index
    %2 = vector.load %arg5[%c0_2, %c384] : memref<1x512xf32, #tpu.memory_space<vmem>>, vector<1x128xf32>
    %c0_3 = arith.constant 0 : index
    %c0_4 = arith.constant 0 : index
    %3 = vector.load %arg1[%c0_3, %c0_4] : memref<8x32xbf16, #tpu.memory_space<vmem>>, vector<8x32xbf16>
    %c0_5 = arith.constant 0 : index
    %c0_6 = arith.constant 0 : index
    %4 = vector.load %arg2[%c0_5, %c0_6] : memref<32x256xbf16, #tpu.memory_space<vmem>>, vector<32x256xbf16>
    %cst = arith.constant dense<0.000000e+00> : vector<8x256xf32>
    %5 = tpu.matmul %3, %4, %cst {dimension_numbers = #tpu.dot_dimension_numbers<[1], [0], [0], [1], [0, 0, 1, 1], [], []>} : vector<8x32xbf16>, vector<32x256xbf16>, vector<8x256xf32> -> vector<8x256xf32>
    %6 = vector.broadcast %0 : vector<1x256xf32> to vector<8x256xf32>
    %7 = arith.addf %5, %6 : vector<8x256xf32>
    %cst_7 = arith.constant 0.000000e+00 : f32
    %8 = vector.broadcast %cst_7 : f32 to vector<8x256xf32>
    %9 = arith.maximumf %7, %8 : vector<8x256xf32>
    %10 = arith.truncf %9 : vector<8x256xf32> to vector<8x256xbf16>
    %c0_8 = arith.constant 0 : index
    %c0_9 = arith.constant 0 : index
    %11 = vector.load %arg3[%c0_8, %c0_9] : memref<256x128xbf16, #tpu.memory_space<vmem>>, vector<256x128xbf16>
    %cst_10 = arith.constant dense<0.000000e+00> : vector<8x128xf32>
    %12 = tpu.matmul %10, %11, %cst_10 {dimension_numbers = #tpu.dot_dimension_numbers<[1], [0], [0], [1], [0, 0, 1, 1], [], []>} : vector<8x256xbf16>, vector<256x128xbf16>, vector<8x128xf32> -> vector<8x128xf32>
    %13 = vector.broadcast %1 : vector<1x128xf32> to vector<8x128xf32>
    %14 = arith.addf %12, %13 : vector<8x128xf32>
    %cst_11 = arith.constant 0.000000e+00 : f32
    %15 = vector.broadcast %cst_11 : f32 to vector<8x128xf32>
    %16 = arith.maximumf %14, %15 : vector<8x128xf32>
    %17 = arith.truncf %16 : vector<8x128xf32> to vector<8x128xbf16>
    %c0_12 = arith.constant 0 : index
    %c0_13 = arith.constant 0 : index
    %18 = vector.load %arg4[%c0_12, %c0_13] : memref<128x128xbf16, #tpu.memory_space<vmem>>, vector<128x128xbf16>
    %cst_14 = arith.constant dense<0.000000e+00> : vector<8x128xf32>
    %19 = tpu.matmul %17, %18, %cst_14 {dimension_numbers = #tpu.dot_dimension_numbers<[1], [0], [0], [1], [0, 0, 1, 1], [], []>} : vector<8x128xbf16>, vector<128x128xbf16>, vector<8x128xf32> -> vector<8x128xf32>
    %20 = vector.broadcast %2 : vector<1x128xf32> to vector<8x128xf32>
    %21 = arith.addf %19, %20 : vector<8x128xf32>
    %cst_15 = arith.constant 0.000000e+00 : f32
    %22 = vector.broadcast %cst_15 : f32 to vector<8x128xf32>
    %23 = arith.maximumf %21, %22 : vector<8x128xf32>
    %24 = math.absf %21 : vector<8x128xf32>
    %cst_16 = arith.constant 0.000000e+00 : f32
    %25 = vector.broadcast %cst_16 : f32 to vector<8x128xf32>
    %26 = arith.subf %25, %24 : vector<8x128xf32>
    %27 = math.exp %26 : vector<8x128xf32>
    %cst_17 = arith.constant 1.000000e+00 : f32
    %28 = vector.broadcast %cst_17 : f32 to vector<8x128xf32>
    %29 = arith.addf %28, %27 : vector<8x128xf32>
    %30 = math.log %29 : vector<8x128xf32>
    %31 = arith.addf %23, %30 : vector<8x128xf32>
    %cst_18 = arith.constant 9.99999997E-7 : f32
    %32 = vector.broadcast %cst_18 : f32 to vector<8x128xf32>
    %33 = arith.addf %31, %32 : vector<8x128xf32>
    %34 = tpu.iota {dimensions = array<i32: 1>} : vector<8x128xi32>
    %c8_i32 = arith.constant 8 : i32
    %35 = vector.broadcast %c8_i32 : i32 to vector<8x128xi32>
    %36 = arith.cmpi sge, %34, %35 : vector<8x128xi32>
    %c16_i32 = arith.constant 16 : i32
    %37 = vector.broadcast %c16_i32 : i32 to vector<8x128xi32>
    %38 = arith.cmpi slt, %34, %37 : vector<8x128xi32>
    %39 = arith.andi %36, %38 : vector<8x128xi1>
    %40 = arith.select %39, %33, %21 : vector<8x128xi1>, vector<8x128xf32>
    %c0_19 = arith.constant 0 : index
    %c0_20 = arith.constant 0 : index
    %41 = vector.load %arg6[%c0_19, %c0_20] : memref<8x128xf32, #tpu.memory_space<vmem>>, vector<8x128xf32>
    tpu.vector_store %arg6[%c0_19, %c0_20], %40 {strides = array<i32>} : memref<8x128xf32, #tpu.memory_space<vmem>>, vector<8x128xf32>,
    return
  }
  func.func @transform_0(%arg0: i32) -> (i32, i32) {
    %c0_i32 = arith.constant 0 : i32
    %c0_i32_0 = arith.constant 0 : i32
    return %arg0, %c0_i32 : i32, i32
  }
  func.func @transform_1(%arg0: i32) -> (i32, i32) {
    %c0_i32 = arith.constant 0 : i32
    %c0_i32_0 = arith.constant 0 : i32
    %c0_i32_1 = arith.constant 0 : i32
    return %c0_i32, %c0_i32_0 : i32, i32
  }
  func.func @transform_2(%arg0: i32) -> (i32, i32) {
    %c0_i32 = arith.constant 0 : i32
    %c0_i32_0 = arith.constant 0 : i32
    %c0_i32_1 = arith.constant 0 : i32
    return %c0_i32, %c0_i32_0 : i32, i32
  }
  func.func @transform_3(%arg0: i32) -> (i32, i32) {
    %c0_i32 = arith.constant 0 : i32
    %c0_i32_0 = arith.constant 0 : i32
    %c0_i32_1 = arith.constant 0 : i32
    return %c0_i32, %c0_i32_0 : i32, i32
  }
  func.func @transform_4(%arg0: i32) -> (i32, i32) {
    %c0_i32 = arith.constant 0 : i32
    %c0_i32_0 = arith.constant 0 : i32
    %c0_i32_1 = arith.constant 0 : i32
    return %c0_i32, %c0_i32_0 : i32, i32
  }
  func.func @transform_5(%arg0: i32) -> (i32, i32) {
    %c0_i32 = arith.constant 0 : i32
    %c0_i32_0 = arith.constant 0 : i32
    return %arg0, %c0_i32 : i32, i32
  }
}

</mosaic_0001>

<bundles_post_ra>
// kernel: actor_critic_forward.1
= control target key start
LH: loop header
LB: loop body
LE: loop exit
PB: predicated region body
PF: predicated region fallthrough
CT: control target
= control target key end

     0   :  { %10 = vsyncpa [#allocation3], 0  ;;  %s713_s0 = inlined_call_operand.vmem [shape: bf16[8,32], index: 0, kind: input, shape index: {}]   ;;  %s714_s1 = inlined_call_operand.hbm [shape: bf16[32,256], index: 1, kind: input, shape index: {}]   ;;  %s715_s2 = inlined_call_operand.hbm [shape: bf16[256,128], index: 2, kind: input, shape index: {}]   ;;  %s716_s3 = inlined_call_operand.hbm [shape: bf16[128,128], index: 3, kind: input, shape index: {}]   ;;  %s717_s4 = inlined_call_operand.vmem [shape: f32[1,512], index: 4, kind: input, shape index: {}]   ;;  %s718_s5 = inlined_call_operand.vmem [shape: f32[8,128], index: 5, kind: output, shape index: {}]  }
   0x1   :  { %11 = vsyncpa [#allocation5], 0  ;;  %s649_s18 = smov [#allocation4]  }
   0x2   :  { %s31_s19 = sshll.u32 %s649_s18, 4  ;;  %s32_s19 = int_to_ptr.vmem [resolvable:$true] %s31_s19 }
   0x3   :  { %s593_s20 = scalar_lea.vmem %s32_s19, 2048  ;;  %p598_p1 = scmp.lt.s32.totalorder %s32_s19, %s32_s19 }
   0x4   :  { %p594_p0 = scmp.ne.s32.totalorder %s32_s19, %s593_s20  ;;  %p599_p2 = scmp.lt.s32.totalorder %s593_s20, %s593_s20 }
   0x6   :  { %p600_p3 = por %p599_p2, %p598_p1 }
   0x8   :  { %p601_p4 = pnand %p600_p3, %p594_p0 }
   0xa   :  { %604 = shalt.err (!%p601_p4)
}
   0xb   :  { %s650_s21 = smov 64   ;;  %s651_s22 = smov 4  }
   0xc   :  { %37 = dma.hbm_to_vmem [thread:$0]  %s715_s2, 2048, %s32_s19, [#allocation5], %s650_s21, %s650_s21, %s651_s22  }
   0xd   :  { %s652_s25 = smov [#allocation2]  }
   0xe   :  { %s19_s26 = sshll.u32 %s652_s25, 4  ;;  %s20_s26 = int_to_ptr.vmem [resolvable:$true] %s19_s26 }
   0xf   :  { %s613_s27 = scalar_lea.vmem %s20_s26, 512  ;;  %p618_p6 = scmp.lt.s32.totalorder %s20_s26, %s20_s26 }
  0x10   :  { %p614_p5 = scmp.ne.s32.totalorder %s20_s26, %s613_s27  ;;  %p619_p7 = scmp.lt.s32.totalorder %s613_s27, %s613_s27 }
  0x12   :  { %p620_p8 = por %p619_p7, %p618_p6 }
  0x14   :  { %p621_p9 = pnand %p620_p8, %p614_p5 }
  0x16   :  { %624 = shalt.err (!%p621_p9)
}
  0x17   :  { %s653_s28 = smov 128   ;;  %s654_s29 = smov 8  }
  0x18   :  { %25 = dma.hbm_to_vmem [thread:$0]  %s714_s1, 512, %s20_s26, [#allocation3], %s653_s28, %s653_s28, %s654_s29  }
  0x19   :  { %s655_s7 = smov [#allocation6]  }
  0x1a   :  { %s43_s8 = sshll.u32 %s655_s7, 4  ;;  %s44_s8 = int_to_ptr.vmem [resolvable:$true] %s43_s8 }
  0x1b   :  { %s633_s2 = scalar_lea.vmem %s44_s8, 1024  ;;  %p638_p11 = scmp.lt.s32.totalorder %s44_s8, %s44_s8 }
  0x1c   :  { %p634_p10 = scmp.ne.s32.totalorder %s44_s8, %s633_s2  ;;  %p639_p12 = scmp.lt.s32.totalorder %s633_s2, %s633_s2 }
  0x1e   :  { %p640_p13 = por %p639_p12, %p638_p11 }
  0x20   :  { %p641_p0 = pnand %p640_p13, %p634_p10 }
  0x22   :  { %644 = shalt.err (!%p641_p0)
}
  0x23   :  { %49 = dma.hbm_to_vmem [thread:$0]  %s716_s3, 1024, %s44_s8, [#allocation5], %s650_s21, %s650_s21, %s651_s22  }
  0x24   :  { %645 = dma.done.wait [#allocation3], 512  }
  0x25   :  { %646 = vsyncadd [#allocation3], 4294966784 }
  0x26   :  { %647 = dma.done.wait [#allocation5], 3072  }
  0x27   :  { %648 = vsyncadd [#allocation5], 4294964224  ;;  %v656_v0 = vmov 0   ;;  %v551_v1 = vld [vmem:[#allocation2 + $0x14] ss:$8 sps:$4 sm:$0xff]   ;;  %vm101_vm0 = vcmask 261120   ;;  %v71_v28 = vlaneseq }
  0x28   :  { %137 = vmatprep.mubr.bf16.mxu0 %v656_v0  ;;  %v553_v2 = vld [vmem:[#allocation2 + $0x10] ss:$8 sps:$4 sm:$0xff]   ;;  %117 = vmatprep.subr.bf16.mxu0 %v551_v1  ;;  %v554_v3 = vld [vmem:[#allocation2 + $0x4] ss:$8 sps:$4 sm:$0xff]   ;;  %v556_v4 = vld [vmem:[#allocation2] ss:$8 sps:$4 sm:$0xff]  }
  0x29   :  { %118 = vmatpush1.bf16.msra.mxu0 %v553_v2  ;;  %v557_v5 = vld [vmem:[#allocation4 + $0x78] sm:$0xff]   ;;  %v65_v7 = vld [vmem:[%s713_s0] sm:$0xf]  ;;  %v559_v8 = vld [vmem:[#allocation4 + $0x70] sm:$0xff]   ;;  %v657_v23 = vmov 0.0   ;;  %v72_v29 = vshrl.u32 %v71_v28, 7 }
  0x2a   :  { %119 = vmatprep.subr.bf16.mxu0 %v554_v3  ;;  %v558_v6 = vld [vmem:[#allocation4 + $0x38] sm:$0xff]   ;;  %490 = vmatprep.subr.bf16.mxu1 %v557_v5  ;;  %v560_v9 = vld [vmem:[#allocation4 + $0x30] sm:$0xff]   ;;  %v561_v10 = vld [vmem:[#allocation4 + $0x68] sm:$0xff]   ;;  %vm658_vm1 = vmmov 0  }
  0x2b   :  { %491 = vmatpush3.bf16.msra.mxu1 %v558_v6  ;;  %v562_v11 = vld [vmem:[#allocation4 + $0x28] sm:$0xff]   ;;  %v563_v12 = vld [vmem:[#allocation4 + $0x60] sm:$0xff]   ;;  %v565_v14 = vld [vmem:[#allocation4 + $0x58] sm:$0xff]   ;;  %v73_v30 = vsub.s32 0, %v72_v29  ;;  %v77_v32 = vsub.s32 1, %v72_v29 }
  0x2c   :  { %492 = vmatprep.subr.bf16.mxu1 %v559_v8  ;;  %v564_v13 = vld [vmem:[#allocation4 + $0x20] sm:$0xff]   ;;  %v566_v15 = vld [vmem:[#allocation4 + $0x18] sm:$0xff]   ;;  %v567_v16 = vld [vmem:[#allocation4 + $0x50] sm:$0xff]  }
  0x2d   :  { %120 = vmatpush1.bf16.msra.mxu0 %v556_v4  ;;  %v568_v17 = vld [vmem:[#allocation4 + $0x10] sm:$0xff]   ;;  %v569_v18 = vld [vmem:[#allocation4 + $0x48] sm:$0xff]   ;;  %v571_v20 = vld [vmem:[#allocation4 + $0x40] sm:$0xff]   ;;  %v447_v4 = vand.u32 127, %v71_v28 }
  0x2e   :  { %v570_v19 = vld [vmem:[#allocation4 + $0x8] sm:$0xff]   ;;  %v572_v21 = vld [vmem:[#allocation4] sm:$0xff]   ;;  %v573_v22 = vld [vmem:[#allocation6 + $0x38] sm:$0xff]   ;;  %521 = vmatprep.subr.bf16.mxu0 %v657_v23 }
  0x2f   :  { %493 = vmatpush3.bf16.msra.mxu1 %v560_v9  ;;  %v574_v24 = vld [vmem:[#allocation6 + $0x30] sm:$0xff]   ;;  %v575_v25 = vld [vmem:[#allocation6 + $0x28] sm:$0xff]   ;;  %v576_v26 = vld [vmem:[#allocation6 + $0x20] sm:$0xff]   ;;  %vm448_vm2 = vcmp.ge.s32.totalorder %v447_v4, 8  ;;  %vm449_vm3 = vcmp.lt.s32.totalorder %v447_v4, 16 }
  0x30   :  { %463 = vmatmul.mubr.msk.bf16.vlgmr.msra.gmra.mxu0 %vm101_vm0, %v65_v7  ;;  %494 = vmatprep.subr.bf16.mxu1 %v561_v10  ;;  %v577_v27 = vld [vmem:[#allocation6 + $0x18] sm:$0xff]   ;;  %v62_v31 = vld [vmem:[%s717_s4] sm:$0x3]  ;;  %v578_v45 = vld [vmem:[#allocation6 + $0x10] sm:$0xff]  }
  0x31   :  { %522 = vmatpush3.bf16.msra.mxu0 %v573_v22  ;;  %v74_v33 = vrot.slane %v62_v31, %v73_v30  ;;  %v78_v34 = vrot.slane %v62_v31, %v77_v32  ;;  %v579_v46 = vld [vmem:[#allocation6 + $0x8] sm:$0xff]   ;;  %v580_v47 = vld [vmem:[#allocation6] sm:$0xff]   ;;  %537 = vmatprep.mubr.msk.bf16.mxu0 %vm658_vm1, %v657_v23  ;;  %vm450_vm4 = vmand %vm448_vm2, %vm449_vm3 }
  0x32   :  { %523 = vmatprep.subr.bf16.mxu0 %v657_v23  ;;  %v464_v49 = vld [vmem:[%s717_s4 + $0x2] ss:$0 sm:$0xff]  ;;  %v481_v57 = vld [vmem:[%s717_s4 + $0x3] ss:$0 sm:$0xff] }
  0x33   :  { %495 = vmatpush3.bf16.msra.mxu1 %v562_v11 }
  0x34   :  { %496 = vmatprep.subr.bf16.mxu1 %v563_v12 }
  0x35   :  { %524 = vmatpush3.bf16.msra.mxu0 %v574_v24 }
  0x36   :  { %525 = vmatprep.subr.bf16.mxu0 %v657_v23 }
  0x37   :  { %497 = vmatpush3.bf16.msra.mxu1 %v564_v13 }
  0x38   :  { %498 = vmatprep.subr.bf16.mxu1 %v565_v14 }
  0x39   :  { %526 = vmatpush3.bf16.msra.mxu0 %v575_v25 }
  0x3a   :  { %527 = vmatprep.subr.bf16.mxu0 %v657_v23 }
  0x3b   :  { %499 = vmatpush3.bf16.msra.mxu1 %v566_v15 }
  0x3c   :  { %500 = vmatprep.subr.bf16.mxu1 %v567_v16 }
  0x3d   :  { %528 = vmatpush3.bf16.msra.mxu0 %v576_v26 }
  0x3e   :  { %529 = vmatprep.subr.bf16.mxu0 %v657_v23 }
  0x3f   :  { %501 = vmatpush3.bf16.msra.mxu1 %v568_v17 }
  0x40   :  { %502 = vmatprep.subr.bf16.mxu1 %v569_v18 }
  0x41   :  { %530 = vmatpush3.bf16.msra.mxu0 %v577_v27 }
  0x42   :  { %531 = vmatprep.subr.bf16.mxu0 %v657_v23 }
  0x43   :  { %503 = vmatpush3.bf16.msra.mxu1 %v570_v19 }
  0x44   :  { %504 = vmatprep.subr.bf16.mxu1 %v571_v20 }
  0x45   :  { %532 = vmatpush3.bf16.msra.mxu0 %v578_v45 }
  0x46   :  { %533 = vmatprep.subr.bf16.mxu0 %v657_v23 }
  0x47   :  { %505 = vmatpush3.bf16.msra.mxu1 %v572_v21 }
  0x49   :  { %534 = vmatpush3.bf16.msra.mxu0 %v579_v46 }
  0x4a   :  { %535 = vmatprep.subr.bf16.mxu0 %v657_v23 }
  0x4d   :  { %536 = vmatpush3.bf16.msra.mxu0 %v580_v47 }
  0xf0   :  { %v139_v35 = vpop.f32.mrf.mxu0 }
  0xf1   :  { %v140_v36 = vadd.f32 %v139_v35, %v74_v33 }
  0xf2   :  { %v141_v37 = vpop.f32.mrf.mxu0 }
  0xf3   :  { %v142_v38 = vadd.f32 %v141_v37, %v78_v34  ;;  %v146_v39 = vmax.f32 %v140_v36, 0.0 }
  0xf4   :  { %v143_v40 = vpop.f32.mrf.mxu0 }
  0xf5   :  { %v147_v41 = vmax.f32 %v142_v38, 0.0  ;;  %v148_v44 = vpack.c.bf16 %v146_v39, %v146_v39 }
  0xf6   :  { %v144_v42 = vpop.f32.mrf.mxu0 }
  0xf7   :  { %v149_v43 = vpack.c.bf16 %v147_v41, %v147_v41 }
  0xf9   :  { %316 = vmatprep.mubr.bf16.mxu1 %v149_v43 }
  0xfa   :  { %317 = vmatmul.mubr.bf16.vlgmr.msra.gmra.mxu1 %v148_v44 }
 0x1ba   :  { %v506_v48 = vpop.f32.mrf.mxu1 }
 0x1bc   :  { %v507_v50 = vpop.f32.mrf.mxu1 }
 0x1bd   :  { %v508_v51 = vadd.f32 %v507_v50, %v506_v48 }
 0x1be   :  { %v509_v52 = vpop.f32.mrf.mxu1 }
 0x1bf   :  { %v319_v53 = vadd.f32 %v508_v51, %v464_v49 }
 0x1c0   :  { %v510_v54 = vpop.f32.mrf.mxu1 }
 0x1c1   :  { %v324_v55 = vmax.f32 %v319_v53, 0.0 }
 0x1c3   :  { %v325_v56 = vpack.c.bf16 %v324_v55, %v324_v55 }
 0x1c5   :  { %538 = vmatmul.mubr.bf16.vlgmr.msra.gmra.mxu0 %v325_v56 }
 0x285   :  { %v430_v58 = vpop.f32.mrf.mxu0 }
 0x286   :  { %v431_v59 = vadd.f32 %v481_v57, %v430_v58 }
 0x287   :  { %v539_v60 = vpop.f32.mrf.mxu0 }
 0x288   :  { %v437_v61 = vand.u32 2147483647, %v431_v59  ;;  %v436_v6 = vmax.f32 %v431_v59, 0.0 }
 0x289   :  { %v433_v62 = vpop.f32.mrf.mxu0 }
 0x28a   :  { %v438_v63 = vsub.f32 0.0, %v437_v61 }
 0x28b   :  { %v540_v0 = vpop.f32.mrf.mxu0 }
 0x28c   :  { %v439_v1 = vmul.f32 1.442695, %v438_v63 }
 0x28e   :  { %581 = vpow2.f32 %v439_v1 }
 0x29b   :  { %v582_v2 = vpop.eup %581 }
 0x29c   :  { %v441_v3 = vadd.f32 1.0, %v582_v2 }
 0x29e   :  { %583 = vlog2.f32 %v441_v3 }
 0x2ab   :  { %v584_v5 = vpop.eup %583 }
 0x2ac   :  { %v443_v7 = vmul.f32 0.6931472, %v584_v5 }
 0x2ae   :  { %v444_v8 = vadd.f32 %v443_v7, %v436_v6 }
 0x2b0   :  { %v445_v9 = vadd.f32 1e-06, %v444_v8 }
 0x2b2   :  { %v451_v10 = vsel %vm450_vm4, %v445_v9, %v431_v59 }
 0x2b3   :  { %452 = vst [vmem:[%s718_s5] sm:$0xff] %v451_v10 }
 0x2b4   :  { %457 = vsyncpa [#allocation3], 1 }
 0x2b5   :  { %458 = vsyncpa [#allocation5], 1 }

</bundles_post_ra>
